<compile_context>
chip_gen: v6e
topology: v6e:2x2x1
jax: 0.10.0
libtpu: 0.0.40
codegen_flags: <defaults>
</compile_context>

<pallas_src>
import math

import jax
import jax.numpy as jnp
from jax.experimental import pallas as pl
from jax.experimental.pallas import tpu as pltpu


def _round_up(n: int, m: int) -> int:
    return ((n + m - 1) // m) * m


def _drop_path_kernel(scale_ref, x_ref, o_ref):
    # scale_ref: (B,) f32 in SMEM, values in {0, 1/keep_prob}
    # x_ref / o_ref: (1, tr, L) VMEM tiles of the current sample b
    b = pl.program_id(0)
    s = scale_ref[b]
    o_ref[...] = (x_ref[...].astype(jnp.float32) * s).astype(o_ref.dtype)


def drop_path(x, drop_prob: float = 0.0, training: bool = False, *, key=None):
    """Pallas TPU implementation of timm-style drop_path (forward)."""
    if drop_prob == 0.0 or not training:
        return x
    if key is None:
        raise ValueError("key is required when training with drop_prob > 0")

    keep_prob = 1.0 - drop_prob
    B = x.shape[0]
    F = math.prod(x.shape[1:]) if x.ndim > 1 else 1

    # Per-sample scale precomputed in float32 (avoids bf16/fp8 quantization of
    # the uniform draw biasing the keep probability).
    u = jax.random.uniform(key, (B,), dtype=jnp.float32)
    scale = jnp.floor(keep_prob + u) / keep_prob  # (B,) f32, in {0, 1/keep_prob}

    # ---- lane-dense per-sample tiling: (B, F) -> (B, R_pad, L) ----
    LANE = 128
    L = 1024 if F >= 1024 else _round_up(max(F, 1), LANE)
    F_pad = _round_up(F, L)
    R = F_pad // L
    if R <= 256:
        tr = R                      # full-extent row block: no sublane constraint
        R_pad = R
    else:
        tr = 256                    # 256 * 1024 * 4B = 1 MiB f32 tile
        R_pad = _round_up(R, tr)

    x2 = x.reshape(B, F)
    pad = R_pad * L - F
    if pad:
        x2 = jnp.pad(x2, ((0, 0), (0, pad)))
    x3 = x2.reshape(B, R_pad, L)

    grid = (B, R_pad // tr)
    itemsize = jnp.dtype(x.dtype).itemsize
    n_elems = B * R_pad * L

    out = pl.pallas_call(
        _drop_path_kernel,
        out_shape=jax.ShapeDtypeStruct((B, R_pad, L), x.dtype),
        grid=grid,
        in_specs=[
            # whole (B,) scale array resident in SMEM, read scalar-wise
            pl.BlockSpec(memory_space=pltpu.MemorySpace.SMEM),
            pl.BlockSpec((1, tr, L), lambda b, r: (b, r, 0)),
        ],
        out_specs=pl.BlockSpec((1, tr, L), lambda b, r: (b, r, 0)),
        # Reuse x3's HBM buffer for the output (footprint, not traffic).
        input_output_aliases={1: 0},
        compiler_params=pltpu.CompilerParams(
            dimension_semantics=("parallel", "parallel"),
        ),
        cost_estimate=pl.CostEstimate(
            flops=n_elems,
            transcendentals=0,
            bytes_accessed=2 * n_elems * itemsize + B * 4,
        ),
    )(scale, x3)

    out = out.reshape(B, R_pad * L)
    if pad:
        out = out[:, :F]
    return out.reshape(x.shape)


class DropPath:
    """Minimal stateless mirror of the PyTorch DropPath module."""

    def __init__(self, drop_prob=None):
        self.drop_prob = 0.0 if drop_prob is None else float(drop_prob)
        self.training = True

    def __call__(self, x, *, key=None):
        return drop_path(x, self.drop_prob, self.training, key=key)


if __name__ == "__main__":
    key = jax.random.PRNGKey(0)
    k_x, k_mask, k_x2, k_mask2 = jax.random.split(key, 4)

    # Small NCHW-like input consistent with the module's usage in a ViT block.
    x = jax.random.normal(k_x, (2, 4, 16, 16), dtype=jnp.float32)

    drop_prob = 0.5
    keep_prob = 1.0 - drop_prob
    module = DropPath(drop_prob)

    # --- training mode: kernel path ---
    y = jax.block_until_ready(module(x, key=k_mask))

    # Pure-JAX reference with the same random draw (matches torch semantics).
    u = jax.random.uniform(k_mask, (x.shape[0],), dtype=jnp.float32)
    mask = jnp.floor(keep_prob + u).reshape(x.shape[0], 1, 1, 1)
    y_ref = x / keep_prob * mask
    assert jnp.allclose(y, y_ref, atol=1e-6, rtol=1e-5), "mismatch vs reference"

    # --- non-128-aligned feature count: exercises the padding path ---
    x_odd = jax.random.normal(k_x2, (2, 3, 5, 7), dtype=jnp.float32)
    y_odd = jax.block_until_ready(drop_path(x_odd, drop_prob, True, key=k_mask2))
    u2 = jax.random.uniform(k_mask2, (x_odd.shape[0],), dtype=jnp.float32)
    mask2 = jnp.floor(keep_prob + u2).reshape(x_odd.shape[0], 1, 1, 1)
    y_odd_ref = x_odd / keep_prob * mask2
    assert jnp.allclose(y_odd, y_odd_ref, atol=1e-6, rtol=1e-5), "padded-path mismatch"

    # --- eval mode: identity (no kernel launch, mirrors PyTorch) ---
    module.training = False
    y_eval = jax.block_until_ready(module(x))
    assert jnp.array_equal(y_eval, x), "eval mode must be identity"

    print("KERNEL_OK")
</pallas_src>

<mosaic_0001>
module attributes {stable_mosaic.version = 11 : i64} {
  func.func @_drop_path_kernel(%arg0: i32, %arg1: i32, %arg2: memref<2xf32, #tpu.memory_space<smem>>, %arg3: memref<1x1x1024xf32, #tpu.memory_space<vmem>>, %arg4: memref<1x1x1024xf32, #tpu.memory_space<vmem>>) attributes {dimension_semantics = [#tpu.dimension_semantics<parallel>, #tpu.dimension_semantics<parallel>], iteration_bounds = array<i64: 2, 1>, scalar_prefetch = 0 : i64, scratch_operands = 0 : i64, tpu.core_type = #tpu.core_type<tc>, window_params = [{transform_indices = @transform_0, window_bounds = array<i64: 2>}, {transform_indices = @transform_1, window_bounds = array<i64: 1, 1, 1024>}, {transform_indices = @transform_2, window_bounds = array<i64: 1, 1, 1024>}]} {
    %0 = arith.index_cast %arg0 : i32 to index
    %1 = memref.load %arg2[%0] : memref<2xf32, #tpu.memory_space<smem>>
    %c0 = arith.constant 0 : index
    %c0_0 = arith.constant 0 : index
    %c0_1 = arith.constant 0 : index
    %2 = vector.load %arg3[%c0, %c0_0, %c0_1] : memref<1x1x1024xf32, #tpu.memory_space<vmem>>, vector<1x1x1024xf32>
    %3 = vector.broadcast %1 : f32 to vector<1x1x1024xf32>
    %4 = arith.mulf %2, %3 : vector<1x1x1024xf32>
    %c0_2 = arith.constant 0 : index
    %c0_3 = arith.constant 0 : index
    %c0_4 = arith.constant 0 : index
    %5 = vector.load %arg4[%c0_2, %c0_3, %c0_4] : memref<1x1x1024xf32, #tpu.memory_space<vmem>>, vector<1x1x1024xf32>
    tpu.vector_store %arg4[%c0_2, %c0_3, %c0_4], %4 {strides = array<i32>} : memref<1x1x1024xf32, #tpu.memory_space<vmem>>, vector<1x1x1024xf32>,
    return
  }
  func.func @transform_0(%arg0: i32, %arg1: i32) -> i32 {
    %c0_i32 = arith.constant 0 : i32
    %c0_i32_0 = arith.constant 0 : i32
    return %c0_i32 : i32
  }
  func.func @transform_1(%arg0: i32, %arg1: i32) -> (i32, i32, i32) {
    %c0_i32 = arith.constant 0 : i32
    %c0_i32_0 = arith.constant 0 : i32
    return %arg0, %arg1, %c0_i32 : i32, i32, i32
  }
  func.func @transform_2(%arg0: i32, %arg1: i32) -> (i32, i32, i32) {
    %c0_i32 = arith.constant 0 : i32
    %c0_i32_0 = arith.constant 0 : i32
    return %arg0, %arg1, %c0_i32 : i32, i32, i32
  }
}

</mosaic_0001>

<bundles_post_ra>
// kernel: tpu_custom_call.1
= control target key start
LH: loop header
LB: loop body
LE: loop exit
PB: predicated region body
PF: predicated region fallthrough
CT: control target
= control target key end

     0   :  { %7 = vsyncpa [#allocation5], 0  ;;  %s711_s0 = inlined_call_operand.vmem [shape: f32[2], index: 0, kind: input, shape index: {}]   ;;  %s712_s1 = inlined_call_operand.hbm [shape: f32[2,1,1024], index: 1, kind: input, shape index: {}, may-alias: {1,2}]   ;;  %s713_s2 = inlined_call_operand.hbm [shape: f32[2,1,1024], index: 2, kind: output, shape index: {}, may-alias: {1,2}]  }
   0x1   :  { %8 = vsyncpa [#allocation3], 0 }
   0x2   :  { %10 = vsyncpa [#allocation3 + $0x1], 0 }
   0x3   :  { %11 = vsyncpa [#allocation4], 0 }
   0x4   :  { %13 = vsyncpa [#allocation4 + $0x1], 0  ;;  %s549_s9 = smov 0   ;;  %s551_s10 = smov 0  }
   0x5   :  { %s553_s11 = smov 0   ;;  %s555_s12 = smov 0  }
   0x6   :  { %s557_s13 = smov 0   ;;  %s559_s14 = smov 0  }
   0x7 LB: > { %s310_s15 = sadd.s32 4294967295, %s529_s14   ;;  %s311_s16 = sadd.s32 4294967294, %s529_s14   ;;  %s529_s14 = sphi %s559_s14, %s19_s14   ;;  %s525_s13 = sphi %s557_s13, %s730_s13   ;;  %s521_s12 = sphi %s555_s12, %s729_s12   ;;  %s517_s11 = sphi %s553_s11, %s728_s11   ;;  %s513_s10 = sphi %s551_s10, %s727_s10   ;;  %s509_s9 = sphi %s549_s9, %s726_s9  }
   0x8   : > { %p74_p0 = scmp.ne.s32.totalorder %s513_s10, %s509_s9  ;;  %p583_p1 = scmp.eq.s32.totalorder %s310_s15, 0 }
   0x9   : > { %p587_p2 = scmp.eq.s32.totalorder %s310_s15, 1  ;;  %p106_p3 = scmp.eq.s32.totalorder %s311_s16, 1 }
   0xa   : > { %p593_p4 = por %p583_p1, %p74_p0  ;;  %p312_p5 = scmp.ge.s32.totalorder %s529_s14, 1 }
   0xb   : > { %p598_p6 = por %p106_p3, %p74_p0  ;;  %p113_p7 = scmp.lt.s32.totalorder %s529_s14, 3 }
   0xc   : > { %s717_s19 = scalar_select %p593_p4, 1, 0 }
   0xd   : > { %s718_s20 = scalar_select %p598_p6, 1, 0 }
   0xe   : > { %s126_s23 = sshll.u32 %s711_s0, 4  ;;  %p606_p8 = pnand %p312_p5, %p113_p7  ;;  %s127_s23 = int_to_ptr.vmem [resolvable:$true] %s126_s23 }
   0xf   : > { %s31_s26 = sadd.s32 1, %s525_s13  ;;  %s61_s27 = sadd.s32 1, %s517_s11 }
  0x10   : > { %p337_p10 = pneg %p606_p8  ;;  %p33_p12 = scmp.ge.s32.totalorder %s31_s26, 2 }
  0x11   : > { %s402_s28 = scalar_lea.vmem %s127_s23, 16  ;;  %p410_p7 = scmp.lt.s32.totalorder %s127_s23, %s127_s23 }
  0x12   : > { %p615_p11 = pnand %p337_p10, %p583_p1  ;;  %p403_p13 = scmp.ne.s32.totalorder %s127_s23, %s402_s28 }
  0x13   : > { %p411_p6 = scmp.lt.s32.totalorder %s402_s28, %s402_s28 }
  0x14   : > { %p404_p0 = pneg %p615_p11 }
  0x15   : > { %p412_p9 = por %p411_p6, %p410_p7 }
  0x16   : > { %p405_p3 = pnand %p404_p0, %p403_p13 }
  0x18   : > { %p406_p5 = pneg %p405_p3 }
  0x1a   : > { %p413_p4 = pnand %p412_p9, %p406_p5 }
  0x1c   : > { %416 = shalt.err (!%p413_p4)
}
  0x1d   : > { %s531_s29 = smov [#allocation2]   ;;  %s732_s26 = smov (%p33_p12, %s31_s26), 0 }
  0x1e   : > { %340 = dma.vmem_to_smem (!%p615_p11), %s127_s23, 16, %s531_s29, [#allocation5]  }
  0x1f   : > { %p68_p10 = scmp.ne.s32.totalorder %s517_s11, %s513_s10  ;;  %p69_p6 = scmp.eq.s32.totalorder %s529_s14, 0 }
  0x20   : > { %s56_s30 = ssub.s32 %s525_s13, %s732_s26  ;;  %p350_p4 = scmp.lt.s32.totalorder %s529_s14, 2 }
  0x21   : > { %p59_p9 = scmp.eq.s32.totalorder %s56_s30, 0  ;;  %p70_p13 = por %p69_p6, %p68_p10 }
  0x22   : > { %p635_p0 = por %p587_p2, %p68_p10  ;;  %s137_s4 = sand.u32 1, %s517_s11  }
  0x23   : > { %s641_s5 = scalar_select %p59_p9, %s517_s11, %s61_s27  }
  0x24   : > { %s315_s6 = sshll.u32 %s137_s4, 3  ;;  %s327_s7 = sshll.u32 %s525_s13, 7 }
  0x25   : > { %s149_s16 = scalar_lea.hbm %s712_s1, %s327_s7  ;;  %s141_s21 = scalar_lea.vmem [#allocation6], %s315_s6 }
  0x26   : > { %s151_s22 = sshll.u32 %s141_s21, 4  ;;  %p647_p11 = pnand %p350_p4, %p70_p13  ;;  %s152_s22 = int_to_ptr.vmem [resolvable:$true] %s151_s22 }
  0x27   : > { %s138_s18 = scalar_lea.sflag [#allocation3], %s137_s4  ;;  %s430_s25 = scalar_lea.vmem %s152_s22, 128 }
  0x28   : > { %p419_p2 = pneg %p647_p11  ;;  %p431_p12 = scmp.ne.s32.totalorder %s152_s22, %s430_s25 }
  0x29   : > { %s532_s27 = smov [#allocation6]  }
  0x2a   : > { %p433_p3 = pnand %p431_p12, %p419_p2  ;;  %s435_s28 = sshll.u32 %s532_s27, 4  ;;  %s436_s28 = int_to_ptr.vmem [resolvable:$false] %s435_s28 }
  0x2b   : > { %s437_s29 = scalar_lea.vmem %s436_s28, 256  ;;  %p438_p7 = scmp.lt.s32.totalorder %s152_s22, %s436_s28 }
  0x2c   : > { %p434_p5 = pneg %p433_p3  ;;  %p439_p10 = scmp.lt.s32.totalorder %s437_s29, %s430_s25 }
  0x2e   : > { %p440_p6 = por %p439_p10, %p438_p7 }
  0x30   : > { %p441_p9 = pnand %p440_p6, %p434_p5 }
  0x32   : > { %444 = shalt.err (!%p441_p9)
}
  0x33   : > { %344 = dma.hbm_to_vmem [thread:$0]  (!%p647_p11), %s149_s16, 128, %s152_s22, %s138_s18  }
  0x34   : > { %160 = sbr.rel (%p606_p8) target bundleno = 88 (0x58), region = 28 }
  0x39   : > { %496 = dma.done.wait (%p583_p1), [#allocation5], 16  }
  0x3a   : > { %498 = vsyncadd (%p583_p1), [#allocation5], 4294967280  ;;  %s662_s30 = sand.u32 1, %s513_s10   ;;  %p723_p4 = scmp.ne.s32.totalorder %s717_s19, 0 }
  0x3b   : > { %s320_s4 = sshll.u32 %s662_s30, 3  ;;  %s167_s6 = scalar_lea.sflag [#allocation3], %s662_s30 }
  0x3c   : > { %s170_s7 = scalar_lea.vmem [#allocation6], %s320_s4 }
  0x3d   : > { %500 = dma.done.wait (%p723_p4), %s167_s6, 128  }
  0x3e   : > { %502 = vsyncadd (%p723_p4), %s167_s6, 4294967168 }
  0x3f   : > { %175 = sfence }
  0x40   : > { %s192_s17 = sld [smem:[#allocation2 + %s521_s12]]  ;;  %v193_v0 = vld [vmem:[%s170_s7] sm:$0xff]  ;;  %s191_s24 = scalar_lea.vmem [#allocation7], %s320_s4 }
  0x41   : > { %s214_s8 = sshll.u32 %s191_s24, 4  ;;  %s328_s15 = sshll.u32 %s521_s12, 7  ;;  %s215_s8 = int_to_ptr.vmem [resolvable:$true] %s214_s8 }
  0x42   : > { %s212_s22 = scalar_lea.hbm %s713_s2, %s328_s15  ;;  %s198_s19 = scalar_lea.sflag [#allocation4], %s662_s30 }
  0x43   : > { %s445_s23 = scalar_lea.vmem %s215_s8, 128  ;;  %s533_s18 = smov [#allocation7]  }
  0x44   : > { %p446_p1 = scmp.ne.s32.totalorder %s215_s8, %s445_s23  ;;  %s449_s25 = sshll.u32 %s533_s18, 4  ;;  %s450_s25 = int_to_ptr.vmem [resolvable:$false] %s449_s25 }
  0x45   : > { %s451_s27 = scalar_lea.vmem %s450_s25, 256  ;;  %p452_p11 = scmp.lt.s32.totalorder %s215_s8, %s450_s25 }
  0x46   : > { %v194_v1 = vstv %s192_s17  ;;  %p447_p8 = pnand %p446_p1, %p635_p0  ;;  %p453_p2 = scmp.lt.s32.totalorder %s451_s27, %s445_s23 }
  0x47   : > { %v195_v2 = vmul.f32 %v194_v1, %v193_v0 }
  0x48   : > { %p448_p13 = pneg %p447_p8  ;;  %p454_p12 = por %p453_p2, %p452_p11 }
  0x49   : > { %196 = vst [vmem:[%s191_s24] sm:$0xff] %v195_v2 }
  0x4a   : > { %p455_p3 = pnand %p454_p12, %p448_p13 }
  0x4c   : > { %458 = shalt.err (!%p455_p3)
}
  0x4d   : > { %s459_s12 = scalar_lea.hbm %s212_s22, 128  ;;  %s463_s30 = scalar_lea.hbm %s713_s2, 256 }
  0x4e   : > { %p460_p5 = scmp.ne.s32.totalorder %s212_s22, %s459_s12  ;;  %p464_p6 = scmp.lt.s32.totalorder %s212_s22, %s713_s2 }
  0x4f   : > { %p465_p9 = scmp.lt.s32.totalorder %s463_s30, %s459_s12 }
  0x50   : > { %p461_p7 = pnand %p460_p5, %p635_p0 }
  0x51   : > { %p466_p4 = por %p465_p9, %p464_p6 }
  0x52   : > { %p462_p10 = pneg %p461_p7 }
  0x54   : > { %p467_p1 = pnand %p466_p4, %p462_p10 }
  0x56   : > { %470 = shalt.err (!%p467_p1)
}
  0x57   : > { %335 = dma.vmem_to_hbm [thread:$0]  (%p635_p0), %s215_s8, 128, %s212_s22, %s198_s19  }
  0x58 PF: > { %s226_s7 = sand.u32 1, %s509_s9   ;;  %p724_p8 = scmp.ne.s32.totalorder %s718_s20, 0 }
  0x59   : > { %p725_p13 = scmp.ge.s32.totalorder %s529_s14, 2  ;;  %s227_s17 = scalar_lea.sflag [#allocation4], %s226_s7 }
  0x5b   : > { %p346_p11 = pnand %p725_p13, %p724_p8 }
  0x5d   : > { %p347_p2 = pneg %p346_p11 }
  0x5f   : > { %504 = dma.done.wait (%p347_p2), %s227_s17, 128  }
  0x60   : > { %506 = vsyncadd (%p347_p2), %s227_s17, 4294967168  ;;  %s19_s14 = sadd.s32 1, %s529_s14   ;;  %s726_s9 = smov %s513_s10 }
  0x61   : > { %p16_p12 = scmp.ge.s32.totalorder %s19_s14, 4   ;;  %s727_s10 = smov %s517_s11 }
  0x62   : > { %s728_s11 = smov %s641_s5  ;;  %s729_s12 = smov %s525_s13 }
  0x63   : > { %s730_s13 = smov %s732_s26  ;;  %18 = sbr.rel (!%p16_p12) target bundleno = 7 (0x7), region = 78 }
  0x68   :  { %232 = vsyncpa [#allocation3], 1 }
  0x69   :  { %234 = vsyncpa [#allocation3 + $0x1], 1 }
  0x6a   :  { %235 = vsyncpa [#allocation4], 1 }
  0x6b   :  { %237 = vsyncpa [#allocation4 + $0x1], 1 }
  0x6c   :  { %238 = vsyncpa [#allocation5], 1 }
  0x6d   :  { %240 = vsyncpa [#allocation5 + $0x1], 1 }

</bundles_post_ra>
